<compile_context>
chip_gen: v7x
topology: tpu7x:2x2x1
jax: 0.10.0
libtpu: 0.0.40
codegen_flags: <defaults>
</compile_context>

<pallas_src>
import functools

import jax
import jax.numpy as jnp
from jax.experimental import pallas as pl
from jax.experimental.pallas import tpu as pltpu


# ---------------------------------------------------------------------------
# Fused single-pass kernel: whole (B_TILE, C, HW) slab resident in VMEM.
# ---------------------------------------------------------------------------
def _ca_fused_kernel(x_ref, w1t_ref, b1_ref, w2t_ref, b2_ref, o_ref):
    # x_ref / o_ref: (B_TILE, C, HW) lane-dense; w*t_ref: (C_in, C_out);
    # b*_ref: (1, C)
    x = x_ref[...]

    # AdaptiveMaxPool2d(1): global max over spatial positions per (batch, chan)
    pooled = jnp.max(x, axis=-1).astype(jnp.float32)              # (B, C)

    # Conv2d(C,C,1) + folded BN -> ReLU  (batched over the B_TILE rows)
    h = jnp.dot(pooled, w1t_ref[...], preferred_element_type=jnp.float32)
    h = jnp.maximum(h + b1_ref[...], 0.0)                         # (B, C)

    # Conv2d(C,C,1) + folded BN -> Sigmoid
    h2 = jnp.dot(h, w2t_ref[...], preferred_element_type=jnp.float32)
    wgt = jax.nn.sigmoid(h2 + b2_ref[...])                        # (B, C)

    # out = weight * x + x == x * (1 + weight), broadcast over spatial lanes
    scale = (1.0 + wgt)[:, :, None]                               # (B, C, 1)
    o_ref[...] = (x.astype(jnp.float32) * scale).astype(o_ref.dtype)


# ---------------------------------------------------------------------------
# Two-pass fallback for slabs too big for VMEM (e.g. large C*H*W on v7x).
# ---------------------------------------------------------------------------
def _ca_pool_mlp_kernel(x_ref, w1t_ref, b1_ref, w2t_ref, b2_ref, scale_ref,
                        pooled_acc, *, hw):
    # grid = (N, n_spatial_tiles); x_ref: (1, C, S_TILE); scale_ref: (1, C, 1)
    s = pl.program_id(1)
    n_s = pl.num_programs(1)

    @pl.when(s == 0)
    def _():
        pooled_acc[...] = jnp.full_like(pooled_acc, -jnp.inf)

    x = x_ref[...].astype(jnp.float32)                            # (1, C, S_TILE)
    s_tile = x_ref.shape[-1]
    if hw % s_tile != 0:
        # Mask out-of-range lanes of the padded last spatial tile (max-safe).
        lane = jax.lax.broadcasted_iota(jnp.int32, x.shape, 2)
        x = jnp.where(s * s_tile + lane < hw, x, -jnp.inf)
    pooled_acc[...] = jnp.maximum(pooled_acc[...], jnp.max(x, axis=-1))

    @pl.when(s == n_s - 1)
    def _():
        pooled = pooled_acc[...]                                  # (1, C)
        h = jnp.dot(pooled, w1t_ref[...], preferred_element_type=jnp.float32)
        h = jnp.maximum(h + b1_ref[...], 0.0)
        h2 = jnp.dot(h, w2t_ref[...], preferred_element_type=jnp.float32)
        wgt = jax.nn.sigmoid(h2 + b2_ref[...])                    # (1, C)
        scale_ref[...] = (1.0 + wgt).reshape(scale_ref.shape)     # (1, C, 1)


def _ca_scale_kernel(x_ref, scale_ref, o_ref):
    # x_ref / o_ref: (1, C, S_TILE); scale_ref: (1, C, 1)
    o_ref[...] = (x_ref[...].astype(jnp.float32)
                  * scale_ref[...]).astype(o_ref.dtype)


# ---------------------------------------------------------------------------
# Wrapper
# ---------------------------------------------------------------------------
def channel_attention(x, w1, b1, w2, b2, *, vmem_budget_bytes=None):
    """ChannelAttention forward. x: (N, C, H, W); w*: (C, C), b*: (C,) with BN folded."""
    N, C, H, W = x.shape
    HW = H * W
    itemsize = jnp.dtype(x.dtype).itemsize
    if vmem_budget_bytes is None:
        # Headroom under v7x's 64 MiB physical VMEM (also fine on v5e/v6e).
        vmem_budget_bytes = 48 << 20

    # Pre-transpose weights (free, in the wrapper) -> kernels never transpose.
    w1t = jnp.asarray(w1, jnp.float32).T
    w2t = jnp.asarray(w2, jnp.float32).T
    b1r = jnp.asarray(b1, jnp.float32).reshape(1, C)
    b2r = jnp.asarray(b2, jnp.float32).reshape(1, C)

    # Lane-dense layout: flatten spatial dims in the wrapper (contiguous, free).
    xf = x.reshape(N, C, HW)

    slab_bytes = C * HW * itemsize          # one batch element's slab
    aux_bytes = 2 * C * C * 4 + 2 * C * 4   # MLP weights + biases

    if 4 * slab_bytes <= vmem_budget_bytes:
        # -------- fused single-pass path (2 in + 2 out pipelined buffers) ---
        b_tile = 1
        for d in range(N, 0, -1):
            if N % d == 0 and 4 * d * slab_bytes <= vmem_budget_bytes:
                b_tile = d
                break
        block_bytes = b_tile * slab_bytes
        vmem_limit = int(max(4 * block_bytes + 4 * aux_bytes + (2 << 20),
                             16 << 20))

        out = pl.pallas_call(
            _ca_fused_kernel,
            out_shape=jax.ShapeDtypeStruct((N, C, HW), x.dtype),
            grid_spec=pltpu.PrefetchScalarGridSpec(
                num_scalar_prefetch=0,
                grid=(N // b_tile,),
                in_specs=[
                    pl.BlockSpec((b_tile, C, HW), lambda n: (n, 0, 0)),  # x
                    pl.BlockSpec((C, C), lambda n: (0, 0)),              # w1^T
                    pl.BlockSpec((1, C), lambda n: (0, 0)),              # b1
                    pl.BlockSpec((C, C), lambda n: (0, 0)),              # w2^T
                    pl.BlockSpec((1, C), lambda n: (0, 0)),              # b2
                ],
                out_specs=pl.BlockSpec((b_tile, C, HW), lambda n: (n, 0, 0)),
            ),
            compiler_params=pltpu.CompilerParams(
                dimension_semantics=("parallel",),
                vmem_limit_bytes=vmem_limit),
        )(xf, w1t, b1r, w2t, b2r)
        return out.reshape(N, C, H, W)

    # -------- two-pass fallback: spatially tiled, stays pipelined -----------
    # (Very large C would additionally need channel tiling; not needed for
    #  typical CNN channel counts since only C*S_TILE must fit in VMEM.)
    s_tile = (vmem_budget_bytes // (6 * C * itemsize)) // 128 * 128
    s_tile = max(128, min(s_tile, pl.cdiv(HW, 128) * 128))
    n_s = pl.cdiv(HW, s_tile)
    vmem_limit = int(max(4 * C * s_tile * itemsize + 4 * aux_bytes + (2 << 20),
                         16 << 20))

    # Pass 1: running max over spatial tiles, then MLP + sigmoid -> (N, C, 1).
    scale = pl.pallas_call(
        functools.partial(_ca_pool_mlp_kernel, hw=HW),
        out_shape=jax.ShapeDtypeStruct((N, C, 1), jnp.float32),
        grid_spec=pltpu.PrefetchScalarGridSpec(
            num_scalar_prefetch=0,
            grid=(N, n_s),
            in_specs=[
                pl.BlockSpec((1, C, s_tile), lambda n, s: (n, 0, s)),
                pl.BlockSpec((C, C), lambda n, s: (0, 0)),
                pl.BlockSpec((1, C), lambda n, s: (0, 0)),
                pl.BlockSpec((C, C), lambda n, s: (0, 0)),
                pl.BlockSpec((1, C), lambda n, s: (0, 0)),
            ],
            out_specs=pl.BlockSpec((1, C, 1), lambda n, s: (n, 0, 0)),
            scratch_shapes=[pltpu.VMEM((1, C), jnp.float32)],
        ),
        compiler_params=pltpu.CompilerParams(
            dimension_semantics=("parallel", "arbitrary"),
            vmem_limit_bytes=vmem_limit),
    )(xf, w1t, b1r, w2t, b2r)

    # Pass 2: elementwise  out = x * (1 + weight), spatially tiled.
    out = pl.pallas_call(
        _ca_scale_kernel,
        out_shape=jax.ShapeDtypeStruct((N, C, HW), x.dtype),
        grid_spec=pltpu.PrefetchScalarGridSpec(
            num_scalar_prefetch=0,
            grid=(N, n_s),
            in_specs=[
                pl.BlockSpec((1, C, s_tile), lambda n, s: (n, 0, s)),
                pl.BlockSpec((1, C, 1), lambda n, s: (n, 0, 0)),
            ],
            out_specs=pl.BlockSpec((1, C, s_tile), lambda n, s: (n, 0, s)),
        ),
        compiler_params=pltpu.CompilerParams(
            dimension_semantics=("parallel", "parallel"),
            vmem_limit_bytes=vmem_limit),
    )(xf, scale)
    return out.reshape(N, C, H, W)


def fold_bn(conv_w, conv_b, gamma, beta, mean, var, eps=1e-5):
    """Fold BatchNorm2d (inference) into a preceding 1x1 conv (weights (C,C))."""
    scale = gamma / jnp.sqrt(var + eps)                    # (C,)
    w_eff = conv_w * scale[:, None]                        # (C_out, C_in)
    b_eff = scale * (conv_b - mean) + beta                 # (C,)
    return w_eff, b_eff


def channel_attention_ref(x, w1, b1, w2, b2):
    """Pure-JAX reference with the same folded parameters."""
    pooled = jnp.max(x, axis=(2, 3))                       # (N, C)
    h = jnp.maximum(pooled @ w1.T + b1, 0.0)
    wgt = jax.nn.sigmoid(h @ w2.T + b2)                    # (N, C)
    return wgt[:, :, None, None] * x + x


if __name__ == "__main__":
    key = jax.random.PRNGKey(0)
    N, C, H, W = 2, 4, 16, 16
    ks = jax.random.split(key, 12)

    x = jax.random.normal(ks[0], (N, C, H, W), dtype=jnp.float32)

    # Conv2d(C, C, 1) parameters (1x1 kernel -> (C_out, C_in) matrices).
    conv1_w = jax.random.normal(ks[1], (C, C), dtype=jnp.float32) * 0.5
    conv1_b = jax.random.normal(ks[2], (C,), dtype=jnp.float32) * 0.1
    conv2_w = jax.random.normal(ks[3], (C, C), dtype=jnp.float32) * 0.5
    conv2_b = jax.random.normal(ks[4], (C,), dtype=jnp.float32) * 0.1

    # BatchNorm2d parameters (inference-mode running statistics).
    bn1_gamma = 1.0 + 0.1 * jax.random.normal(ks[5], (C,), dtype=jnp.float32)
    bn1_beta = 0.1 * jax.random.normal(ks[6], (C,), dtype=jnp.float32)
    bn1_mean = 0.1 * jax.random.normal(ks[7], (C,), dtype=jnp.float32)
    bn1_var = jnp.abs(1.0 + 0.1 * jax.random.normal(ks[8], (C,), dtype=jnp.float32))
    bn2_gamma = 1.0 + 0.1 * jax.random.normal(ks[9], (C,), dtype=jnp.float32)
    bn2_beta = 0.1 * jax.random.normal(ks[10], (C,), dtype=jnp.float32)
    bn2_mean = jnp.zeros((C,), dtype=jnp.float32)
    bn2_var = jnp.ones((C,), dtype=jnp.float32)

    # TODO(synk): BatchNorm is implemented in inference mode (running stats)
    # and folded into the 1x1 convs; training-mode batch statistics are not
    # computed in-kernel.
    w1, b1 = fold_bn(conv1_w, conv1_b, bn1_gamma, bn1_beta, bn1_mean, bn1_var)
    w2, b2 = fold_bn(conv2_w, conv2_b, bn2_gamma, bn2_beta, bn2_mean, bn2_var)

    ref = channel_attention_ref(x, w1, b1, w2, b2)

    # Default fused single-pass path (whole slab fits the VMEM budget).
    out = jax.block_until_ready(channel_attention(x, w1, b1, w2, b2))
    assert out.shape == (N, C, H, W)
    assert jnp.allclose(out, ref, atol=1e-5, rtol=1e-5), "fused mismatch"

    # Force the two-pass spatially-tiled fallback (large-slab / v7x path).
    out2 = jax.block_until_ready(
        channel_attention(x, w1, b1, w2, b2, vmem_budget_bytes=4 * 1024))
    assert jnp.allclose(out2, ref, atol=1e-5, rtol=1e-5), "two-pass mismatch"

    # Non-128-aligned spatial size exercises the masked edge spatial tile.
    x_odd = jax.random.normal(ks[11], (N, C, 10, 10), dtype=jnp.float32)
    ref_odd = channel_attention_ref(x_odd, w1, b1, w2, b2)
    out_odd = jax.block_until_ready(channel_attention(x_odd, w1, b1, w2, b2))
    out_odd2 = jax.block_until_ready(
        channel_attention(x_odd, w1, b1, w2, b2, vmem_budget_bytes=4 * 1024))
    assert jnp.allclose(out_odd, ref_odd, atol=1e-5, rtol=1e-5), "fused odd mismatch"
    assert jnp.allclose(out_odd2, ref_odd, atol=1e-5, rtol=1e-5), "two-pass odd mismatch"

    print("KERNEL_OK")
</pallas_src>

<mosaic_0001>
module attributes {stable_mosaic.version = 11 : i64} {
  func.func @_ca_fused_kernel(%arg0: i32, %arg1: memref<2x4x256xf32, #tpu.memory_space<vmem>>, %arg2: memref<4x4xf32, #tpu.memory_space<vmem>>, %arg3: memref<1x4xf32, #tpu.memory_space<vmem>>, %arg4: memref<4x4xf32, #tpu.memory_space<vmem>>, %arg5: memref<1x4xf32, #tpu.memory_space<vmem>>, %arg6: memref<2x4x256xf32, #tpu.memory_space<vmem>>) attributes {dimension_semantics = [#tpu.dimension_semantics<parallel>], iteration_bounds = array<i64: 1>, scalar_prefetch = 0 : i64, scratch_operands = 0 : i64, tpu.core_type = #tpu.core_type<tc>, window_params = [{transform_indices = @transform_0, window_bounds = array<i64: 2, 4, 256>}, {pipeline_mode = #tpu.pipeline_mode<synchronous>, transform_indices = @transform_1, window_bounds = array<i64: 4, 4>}, {pipeline_mode = #tpu.pipeline_mode<synchronous>, transform_indices = @transform_2, window_bounds = array<i64: 1, 4>}, {pipeline_mode = #tpu.pipeline_mode<synchronous>, transform_indices = @transform_3, window_bounds = array<i64: 4, 4>}, {pipeline_mode = #tpu.pipeline_mode<synchronous>, transform_indices = @transform_4, window_bounds = array<i64: 1, 4>}, {transform_indices = @transform_5, window_bounds = array<i64: 2, 4, 256>}]} {
    %c0 = arith.constant 0 : index
    %c0_0 = arith.constant 0 : index
    %c0_1 = arith.constant 0 : index
    %0 = vector.load %arg1[%c0, %c0_0, %c0_1] : memref<2x4x256xf32, #tpu.memory_space<vmem>>, vector<2x4x256xf32>
    %cst = arith.constant dense<0xFF800000> : vector<2x4xf32>
    %1 = vector.multi_reduction <maximumf>, %0, %cst [2] : vector<2x4x256xf32> to vector<2x4xf32>
    %c0_2 = arith.constant 0 : index
    %c0_3 = arith.constant 0 : index
    %2 = vector.load %arg2[%c0_2, %c0_3] : memref<4x4xf32, #tpu.memory_space<vmem>>, vector<4x4xf32>
    %cst_4 = arith.constant dense<0.000000e+00> : vector<2x4xf32>
    %3 = tpu.matmul %1, %2, %cst_4 {dimension_numbers = #tpu.dot_dimension_numbers<[1], [0], [0], [1], [0, 0, 1, 1], [], []>} : vector<2x4xf32>, vector<4x4xf32>, vector<2x4xf32> -> vector<2x4xf32>
    %c0_5 = arith.constant 0 : index
    %c0_6 = arith.constant 0 : index
    %4 = vector.load %arg3[%c0_5, %c0_6] : memref<1x4xf32, #tpu.memory_space<vmem>>, vector<1x4xf32>
    %5 = vector.broadcast %4 : vector<1x4xf32> to vector<2x4xf32>
    %6 = arith.addf %3, %5 : vector<2x4xf32>
    %cst_7 = arith.constant 0.000000e+00 : f32
    %7 = vector.broadcast %cst_7 : f32 to vector<2x4xf32>
    %8 = arith.maximumf %6, %7 : vector<2x4xf32>
    %c0_8 = arith.constant 0 : index
    %c0_9 = arith.constant 0 : index
    %9 = vector.load %arg4[%c0_8, %c0_9] : memref<4x4xf32, #tpu.memory_space<vmem>>, vector<4x4xf32>
    %cst_10 = arith.constant dense<0.000000e+00> : vector<2x4xf32>
    %10 = tpu.matmul %8, %9, %cst_10 {dimension_numbers = #tpu.dot_dimension_numbers<[1], [0], [0], [1], [0, 0, 1, 1], [], []>} : vector<2x4xf32>, vector<4x4xf32>, vector<2x4xf32> -> vector<2x4xf32>
    %c0_11 = arith.constant 0 : index
    %c0_12 = arith.constant 0 : index
    %11 = vector.load %arg5[%c0_11, %c0_12] : memref<1x4xf32, #tpu.memory_space<vmem>>, vector<1x4xf32>
    %12 = vector.broadcast %11 : vector<1x4xf32> to vector<2x4xf32>
    %13 = arith.addf %10, %12 : vector<2x4xf32>
    %14 = arith.negf %13 : vector<2x4xf32>
    %15 = math.exp %14 : vector<2x4xf32>
    %cst_13 = arith.constant 1.000000e+00 : f32
    %16 = vector.broadcast %cst_13 : f32 to vector<2x4xf32>
    %17 = arith.addf %16, %15 : vector<2x4xf32>
    %18 = arith.divf %16, %17 : vector<2x4xf32>
    %cst_14 = arith.constant 1.000000e+00 : f32
    %19 = vector.broadcast %cst_14 : f32 to vector<2x4xf32>
    %20 = arith.addf %19, %18 : vector<2x4xf32>
    %21 = vector.shape_cast %20 : vector<2x4xf32> to vector<2x4x1xf32>
    %22 = vector.broadcast %21 : vector<2x4x1xf32> to vector<2x4x256xf32>
    %23 = arith.mulf %0, %22 : vector<2x4x256xf32>
    %c0_15 = arith.constant 0 : index
    %c0_16 = arith.constant 0 : index
    %c0_17 = arith.constant 0 : index
    %24 = vector.load %arg6[%c0_15, %c0_16, %c0_17] : memref<2x4x256xf32, #tpu.memory_space<vmem>>, vector<2x4x256xf32>
    tpu.vector_store %arg6[%c0_15, %c0_16, %c0_17], %23 {strides = array<i32>} : memref<2x4x256xf32, #tpu.memory_space<vmem>>, vector<2x4x256xf32>,
    return
  }
  func.func @transform_0(%arg0: i32) -> (i32, i32, i32) {
    %c0_i32 = arith.constant 0 : i32
    %c0_i32_0 = arith.constant 0 : i32
    %c0_i32_1 = arith.constant 0 : i32
    return %arg0, %c0_i32, %c0_i32_0 : i32, i32, i32
  }
  func.func @transform_1(%arg0: i32) -> (i32, i32) {
    %c0_i32 = arith.constant 0 : i32
    %c0_i32_0 = arith.constant 0 : i32
    %c0_i32_1 = arith.constant 0 : i32
    return %c0_i32, %c0_i32_0 : i32, i32
  }
  func.func @transform_2(%arg0: i32) -> (i32, i32) {
    %c0_i32 = arith.constant 0 : i32
    %c0_i32_0 = arith.constant 0 : i32
    %c0_i32_1 = arith.constant 0 : i32
    return %c0_i32, %c0_i32_0 : i32, i32
  }
  func.func @transform_3(%arg0: i32) -> (i32, i32) {
    %c0_i32 = arith.constant 0 : i32
    %c0_i32_0 = arith.constant 0 : i32
    %c0_i32_1 = arith.constant 0 : i32
    return %c0_i32, %c0_i32_0 : i32, i32
  }
  func.func @transform_4(%arg0: i32) -> (i32, i32) {
    %c0_i32 = arith.constant 0 : i32
    %c0_i32_0 = arith.constant 0 : i32
    %c0_i32_1 = arith.constant 0 : i32
    return %c0_i32, %c0_i32_0 : i32, i32
  }
  func.func @transform_5(%arg0: i32) -> (i32, i32, i32) {
    %c0_i32 = arith.constant 0 : i32
    %c0_i32_0 = arith.constant 0 : i32
    %c0_i32_1 = arith.constant 0 : i32
    return %arg0, %c0_i32, %c0_i32_0 : i32, i32, i32
  }
}

</mosaic_0001>

<bundles_post_ra>
// kernel: tpu_custom_call.1
= control target key start
LH: loop header
LB: loop body
LE: loop exit
PB: predicated region body
PF: predicated region fallthrough
CT: control target
= control target key end

     0   :  { %10 = vsyncpa [#allocation3], 0  ;;  %s524_s0 = inlined_call_operand.hbm [shape: f32[2,4,256], index: 0, kind: input, shape index: {}]   ;;  %s525_s1 = inlined_call_operand.hbm [shape: f32[4,4], index: 1, kind: input, shape index: {}]   ;;  %s526_s2 = inlined_call_operand.vmem [shape: f32[1,4], index: 2, kind: input, shape index: {}]   ;;  %s527_s3 = inlined_call_operand.vmem [shape: f32[4,4], index: 3, kind: input, shape index: {}]   ;;  %s528_s4 = inlined_call_operand.vmem [shape: f32[1,4], index: 4, kind: input, shape index: {}]   ;;  %s529_s5 = inlined_call_operand.hbm [shape: f32[2,4,256], index: 5, kind: output, shape index: {}]  }
   0x1   :  { %11 = vsyncpa [#allocation6], 0 }
   0x2   :  { %12 = vsyncpa [#allocation4], 0  ;;  %s417_s18 = smov [#allocation2]   ;;  %s345_s22 = scalar_lea.hbm %s524_s0, 256 }
   0x3   :  { %s18_s19 = sshll.u32 %s417_s18, 4  ;;  %p346_p0 = scmp.ne.s32.totalorder %s524_s0, %s345_s22  ;;  %s19_s19 = int_to_ptr.vmem [resolvable:$true] %s18_s19 }
   0x4   :  { %p349_p1 = scmp.lt.u32.totalorder %s345_s22, %s524_s0 }
   0x6   :  { %p351_p2 = pnand %p349_p1, %p346_p0 }
   0x8   :  { %354 = shalt.err (!%p351_p2)
}
   0x9   :  { %s355_s27 = scalar_lea.vmem %s19_s19, 256  ;;  %p360_p4 = scmp.lt.s32.totalorder %s19_s19, %s19_s19 }
   0xa   :  { %p356_p3 = scmp.ne.s32.totalorder %s19_s19, %s355_s27  ;;  %p361_p5 = scmp.lt.s32.totalorder %s355_s27, %s355_s27 }
   0xc   :  { %p362_p6 = por %p361_p5, %p360_p4 }
   0xe   :  { %p363_p7 = pnand %p362_p6, %p356_p3 }
  0x10   :  { %366 = shalt.err (!%p363_p7)
}
  0x11   :  { %s418_s28 = smov 128   ;;  %s419_s29 = smov 8  }
  0x12   :  { %24 = dma.hbm_to_vmem [thread:$0]  %s524_s0, 256, %s19_s19, [#allocation3], %s418_s28, %s418_s28, %s419_s29  }
  0x13   :  { %s420_s7 = smov [#allocation5]   ;;  %s367_s11 = scalar_lea.hbm %s525_s1, 64 }
  0x14   :  { %s31_s8 = sshll.u32 %s420_s7, 4  ;;  %p368_p8 = scmp.ne.s32.totalorder %s525_s1, %s367_s11  ;;  %s32_s8 = int_to_ptr.vmem [resolvable:$true] %s31_s8 }
  0x15   :  { %p371_p9 = scmp.lt.u32.totalorder %s367_s11, %s525_s1 }
  0x17   :  { %p373_p10 = pnand %p371_p9, %p368_p8 }
  0x19   :  { %376 = shalt.err (!%p373_p10)
}
  0x1a   :  { %s377_s16 = scalar_lea.vmem %s32_s8, 64  ;;  %p382_p12 = scmp.lt.s32.totalorder %s32_s8, %s32_s8 }
  0x1b   :  { %p378_p11 = scmp.ne.s32.totalorder %s32_s8, %s377_s16  ;;  %p383_p13 = scmp.lt.s32.totalorder %s377_s16, %s377_s16 }
  0x1d   :  { %p384_p0 = por %p383_p13, %p382_p12 }
  0x1f   :  { %p385_p1 = pnand %p384_p0, %p378_p11 }
  0x21   :  { %388 = shalt.err (!%p385_p1)
}
  0x22   :  { %34 = dma.hbm_to_vmem [thread:$0]  %s525_s1, 64, %s32_s8, [#allocation6]  }
  0x23   :  { %411 = dma.done.wait [#allocation3], 256  }
  0x24   :  { %412 = vsyncadd [#allocation3], 4294967040 }
  0x25   :  { %413 = dma.done.wait [#allocation6], 64  }
  0x26   :  { %414 = vsyncadd [#allocation6], 4294967232  ;;  %vm55_vm0 = vcmask 1043456   ;;  %v482_v0 = vld [vmem:[#allocation2] sm:$0xff]  ;;  %v484_v1 = vld [vmem:[#allocation2 + $0x8] sm:$0xff]  ;;  %v421_v11 = vmov 0.0   ;;  %v76_v12 = vlaneseq }
  0x27   :  { %v51_v2 = vcombine.high %v482_v0, %v482_v0  ;;  %v56_v3 = vsel %vm55_vm0, %v482_v0, -inf  ;;  %v52_v4 = vcombine.high %v484_v1, %v484_v1  ;;  %v61_v6 = vsel %vm55_vm0, %v484_v1, -inf  ;;  %v66_v10 = vld [vmem:[#allocation5] sm:$0xf]  ;;  %321 = vmatprep.subr.mxu0 %v421_v11  ;;  %326 = vmatprep.subr.mxu1 %v421_v11  ;;  %v165_v21 = vld [vmem:[%s527_s3] sm:$0xf] }
  0x28   :  { %vm422_vm1 = vmmov 0   ;;  %322 = vmatpush3.msk.msra.mxu0 %vm55_vm0, %v66_v10  ;;  %v77_v13 = vand.u32 127, %v76_v12  ;;  %v79_v14 = vshrl.u32 %v76_v12, 7  ;;  %vm86_vm2 = vcmask 1041409   ;;  %327 = vmatpush3.msk.msra.mxu1 %vm55_vm0, %v165_v21  ;;  %v310_v22 = vld [vmem:[%s526_s2] ss:$0 sm:$0xff] }
  0x29   :  { %v57_v5 = vsel %vm55_vm0, %v51_v2, -inf  ;;  %v62_v7 = vsel %vm55_vm0, %v52_v4, -inf  ;;  %323 = vmatprep.mubr.msk.f32.mxu0 %vm422_vm1, %v421_v11  ;;  %328 = vmatprep.mubr.msk.f32.mxu1 %vm422_vm1, %v421_v11  ;;  %vm88_vm3 = vcmask 31744   ;;  %v313_v27 = vld [vmem:[%s528_s4] ss:$0 sm:$0xff]  ;;  %s424_s2 = smov [#allocation7]  }
  0x2a   :  { %v58_v8 = vmax.f32 %v56_v3, %v57_v5  ;;  %v63_v9 = vmax.f32 %v61_v6, %v62_v7  ;;  %v80_v16 = vsub.s32 %v77_v13, %v79_v14  ;;  %v258_v34 = vsub.s32 0, %v79_v14  ;;  %s297_s3 = sshll.u32 %s424_s2, 4  ;;  %s298_s3 = int_to_ptr.vmem [resolvable:$true] %s297_s3 }
  0x2b   :  { %v265_v38 = vsub.s32 1, %v79_v14  ;;  %v423_v40 = vmov 839922192   ;;  %s389_s4 = scalar_lea.vmem %s298_s3, 256  ;;  %p394_p3 = scmp.lt.s32.totalorder %s298_s3, %s298_s3 }
  0x2c   :  { %59 = vmax.xlane.f32.xlu0 %v58_v8  ;;  %v273_v41 = vunpack.c.l.s4 %v423_v40  ;;  %p390_p2 = scmp.ne.s32.totalorder %s298_s3, %s389_s4  ;;  %p395_p4 = scmp.lt.s32.totalorder %s389_s4, %s389_s4 }
  0x2e   :  { %v274_v42 = vunpack.c.0.s8 %v273_v41  ;;  %p396_p5 = por %p395_p4, %p394_p3 }
  0x30   :  { %64 = vmax.xlane.f32.xlu0 %v63_v9  ;;  %v277_v43 = vsub.s32 %v274_v42, %v79_v14  ;;  %p397_p6 = pnand %p396_p5, %p390_p2 }
  0xb9   :  { %v60_v15 = vpop.xlane.xlu0 %59 }
  0xba   :  { %v81_v18 = vrot.slane %v60_v15, %v80_v16 }
  0xbd   :  { %v65_v17 = vpop.xlane.xlu0 %64 }
  0xbe   :  { %v85_v19 = vrot.slane %v65_v17, %v80_v16 }
  0xc0   :  { %v87_v20 = vsel %vm86_vm2, %v85_v19, %v81_v18 }
  0xc1   :  { %324 = vmatmul.mubr.msk.f32.vlgmr.msra.gmra.mrb[0].mxu0 %vm88_vm3, %v87_v20 }
 0x194   :  { %v160_v23 = vpop.f32.mrb[0].mxu0 }
 0x195   :  { %v161_v24 = vadd.f32 %v310_v22, %v160_v23  ;;  %v325_v25 = vpop.f32.mrb[1].mxu0 }
 0x197   :  { %v164_v26 = vmax.f32 %v161_v24, 0.0 }
 0x199   :  { %329 = vmatmul.mubr.msk.f32.vlgmr.msra.gmra.mrb[0].mxu1 %vm88_vm3, %v164_v26 }
 0x26c   :  { %v245_v28 = vpop.f32.mrb[0].mxu1 }
 0x26d   :  { %v246_v29 = vadd.f32 %v313_v27, %v245_v28  ;;  %v330_v30 = vpop.f32.mrb[1].mxu1 }
 0x26f   :  { %v316_v31 = vmul.f32 -1.442695, %v246_v29 }
 0x271   :  { %341 = vpow2.f32 %v316_v31 }
 0x27b   :  { %v342_v32 = vpop.eup %341 }
 0x27c   :  { %v252_v33 = vadd.f32 1.0, %v342_v32 }
 0x27e   :  { %343 = vrcp.f32 %v252_v33 }
 0x288   :  { %v344_v35 = vpop.eup %343 }
 0x289   :  { %v255_v36 = vadd.f32 1.0, %v344_v35 }
 0x28b   :  { %v259_v37 = vrot.slane %v255_v36, %v258_v34  ;;  %v266_v39 = vrot.slane %v255_v36, %v265_v38 }
 0x28d   :  { %261 = vbcast.lane.b32.xlu1 %v259_v37, 256 }
 0x291   :  { %268 = vbcast.lane.b32.xlu1 %v266_v39, 256 }
 0x2ff   :  { %v262_v44 = vpop.permute.xlu1 %261 }
 0x300   :  { %v278_v45 = vrot.slane %v262_v44, %v277_v43 }
 0x302   :  { %v288_v46 = vmul.f32 %v278_v45, %v482_v0 }
 0x303   :  { %v269_v47 = vpop.permute.xlu1 %268 }
 0x304   :  { %290 = vst [vmem:[#allocation7] sm:$0xff] %v288_v46  ;;  %v285_v48 = vrot.slane %v269_v47, %v277_v43 }
 0x306   :  { %v289_v49 = vmul.f32 %v285_v48, %v484_v1 }
 0x308   :  { %291 = vst [vmem:[#allocation7 + $0x8] sm:$0xff] %v289_v49 }
 0x309   :  { %400 = shalt.err (!%p397_p6)
}
 0x30a   :  { %s401_s25 = scalar_lea.hbm %s529_s5, 256 }
 0x30b   :  { %p402_p7 = scmp.ne.s32.totalorder %s529_s5, %s401_s25  ;;  %p405_p8 = scmp.lt.u32.totalorder %s401_s25, %s529_s5 }
 0x30d   :  { %p407_p9 = pnand %p405_p8, %p402_p7 }
 0x30f   :  { %410 = shalt.err (!%p407_p9)
}
 0x310   :  { %303 = dma.vmem_to_hbm [thread:$0]  %s298_s3, 256, %s529_s5, [#allocation4], %s418_s28, %s418_s28, %s419_s29  }
 0x311   :  { %415 = dma.done.wait [#allocation4], 256  }
 0x312   :  { %416 = vsyncadd [#allocation4], 4294967040 }
 0x313   :  { %307 = vsyncpa [#allocation3], 1 }
 0x314   :  { %308 = vsyncpa [#allocation6], 1 }
 0x315   :  { %309 = vsyncpa [#allocation4], 1 }

</bundles_post_ra>
